<compile_context>
chip_gen: v7x
topology: tpu7x:2x2x1
jax: 0.10.0
libtpu: 0.0.40
codegen_flags: <defaults>
</compile_context>

<pallas_src>
import functools

import jax
import jax.numpy as jnp
from jax.experimental import pallas as pl
from jax.experimental.pallas import tpu as pltpu


def _gru_ode_kernel(h_ref, wrz_ref, wn_ref, dh_ref):
    """dh = (1 - z) * (g - h) for one (block_b, H) batch tile."""
    h = h_ref[...]                                     # native dtype (f32/bf16)
    hidden = h.shape[-1]

    # Fused r/z gates: one (block_b, H) @ (H, 2H) MXU matmul, f32 accumulation.
    rz = jnp.dot(h, wrz_ref[...], preferred_element_type=jnp.float32)

    # sigmoid(x) = 0.5*tanh(0.5*x) + 0.5  -> one EUP push per element
    # (vs. exp + reciprocal for the logistic lowering).
    r = 0.5 * jnp.tanh(0.5 * rz[:, :hidden]) + 0.5
    z = 0.5 * jnp.tanh(0.5 * rz[:, hidden:]) + 0.5

    # Candidate gate: (r * h) @ Wn^T.  Cast r down once and multiply in the
    # matmul dtype (bf16 VALU on v6e/v7x; no-op cast for f32 inputs).
    rh = r.astype(h.dtype) * h
    g = jnp.tanh(jnp.dot(rh, wn_ref[...], preferred_element_type=jnp.float32))

    h32 = h.astype(jnp.float32)
    dh_ref[...] = ((1.0 - z) * (g - h32)).astype(dh_ref.dtype)


def prepare_gru_ode_weights(w_hr, w_hz, w_hn, dtype=None):
    """One-time weight prep: (out,in) -> (in,out), fuse Wr/Wz along out-dim.

    Call this OUTSIDE the ODE-solver loop so transposes/concat are not
    re-materialized in HBM on every cell evaluation.  Pass dtype=jnp.bfloat16
    (with a bf16 h) for the fast MXU path on all generations.
    TODO(synk): optional fp8 (e4m3) weight dtype for the v7x MXU (bf16 h x fp8
    W) — halves weight VMEM/HBM bytes but needs numerical validation.
    """
    wrz = jnp.concatenate([w_hr.T, w_hz.T], axis=1)   # (H, 2H) = [Wr^T | Wz^T]
    wn = w_hn.T                                       # (H, H)
    if dtype is not None:
        wrz = wrz.astype(dtype)
        wn = wn.astype(dtype)
    return wrz, wn


def _vmem_capacity_bytes():
    """Per-core VMEM capacity (v5e/v6e 128 MiB, v7x 64 MiB); safe fallback."""
    try:
        return int(pltpu.get_tpu_info().vmem_capacity_bytes)
    except Exception:  # interpret mode / older runtimes
        return 64 * 1024 * 1024


@functools.partial(jax.jit, static_argnames=("block_b",))
def gru_ode_cell(h, wrz, wn, *, block_b=None):
    """dh for the GRU-ODE cell.

    Args:
      h:   (B, H) hidden state (f32 or bf16).
      wrz: (H, 2H) fused, pre-transposed [Wr^T | Wz^T] (prepare_gru_ode_weights).
      wn:  (H, H) pre-transposed Wn^T.
      block_b: batch tile size; default heuristic targets 128-512 rows with at
        least 2 grid steps (v7x megacore), bounded by VMEM.
    Returns:
      dh: (B, H), same dtype as h.
    """
    B, H = h.shape
    assert wrz.shape == (H, 2 * H), wrz.shape
    assert wn.shape == (H, H), wn.shape

    # Lane-dense hidden size keeps the rz[:, :H]/[:, H:] slices and the dh
    # store on (8,128) tile boundaries (biggest measured layout lever).
    # TODO(synk): pad H (and the weights) up to a multiple of 128 for general
    # hidden sizes instead of rejecting them.
    if H % 128 != 0:
        raise ValueError(f"hidden_size={H} must be a multiple of 128.")

    # Mixed dtypes silently promote the matmul to the slow f32 MXU path.
    if (jnp.dtype(wrz.dtype) != jnp.dtype(wn.dtype)
            or jnp.dtype(h.dtype) != jnp.dtype(wrz.dtype)):
        raise ValueError(
            f"h ({h.dtype}) and weights ({wrz.dtype}/{wn.dtype}) must share a "
            "dtype (f32 or bf16).")

    itemsize = jnp.dtype(h.dtype).itemsize
    w_itemsize = jnp.dtype(wrz.dtype).itemsize
    wbytes = 3 * H * H * w_itemsize
    vmem_cap = _vmem_capacity_bytes()

    # TODO(synk): generation-aware weight streaming — when 3*H*H weight bytes
    # approach per-core VMEM (v7x 64 MiB: ~H>=2.3k f32 / ~3.3k bf16; v5e/v6e
    # 128 MiB: ~2x that), add K/N grid axes so weights stream from HBM instead
    # of being fully VMEM-resident.
    if wbytes > vmem_cap - (8 << 20):
        raise ValueError(
            f"weights ({wbytes} B) do not fit per-core VMEM ({vmem_cap} B); "
            "weight-streaming path not implemented.")

    # Per-row VMEM: double-buffered h + dh tiles plus ~6 f32-wide intermediates
    # (rz is 2H wide) — intermediates are invisible to IO-buffer accounting.
    per_row = H * (6 * itemsize + 28)

    if block_b is None:
        if B <= 8:
            block_b = B
        else:
            block_b = min(512, B)
            # >= 2 grid steps so ("parallel",) can shard over v7x's 2 TCs.
            block_b = min(block_b, pl.cdiv(B, 2))
            avail = max(vmem_cap - wbytes - (8 << 20), 8 * per_row)
            block_b = min(block_b, avail // per_row)
            block_b = max(8, (block_b // 8) * 8)        # sublane aligned
    else:
        block_b = min(block_b, B)
        if block_b != B and block_b % 8 != 0:
            block_b = max(8, (block_b // 8) * 8)

    num_blocks = pl.cdiv(B, block_b)   # ragged tail handled by Pallas masking

    # Explicit scoped-VMEM limit: weights (single-buffered) + double-buffered
    # h/dh tiles + f32 intermediates, with headroom; capped at physical VMEM.
    needed = wbytes + 4 * block_b * H * itemsize + block_b * per_row
    vmem_limit = int(min(vmem_cap, max(needed + (4 << 20), 32 << 20)))

    cost = pl.CostEstimate(
        flops=2 * B * H * 3 * H,
        transcendentals=3 * B * H,
        bytes_accessed=2 * B * H * itemsize + wbytes,
    )

    dh = pl.pallas_call(
        _gru_ode_kernel,
        out_shape=jax.ShapeDtypeStruct((B, H), h.dtype),
        grid_spec=pltpu.PrefetchScalarGridSpec(
            num_scalar_prefetch=0,
            grid=(num_blocks,),
            in_specs=[
                pl.BlockSpec((block_b, H), lambda i: (i, 0)),        # h tile
                pl.BlockSpec((H, 2 * H), lambda i: (0, 0),
                             pipeline_mode=pl.Buffered(1)),          # [Wr|Wz]^T
                pl.BlockSpec((H, H), lambda i: (0, 0),
                             pipeline_mode=pl.Buffered(1)),          # Wn^T
            ],
            out_specs=pl.BlockSpec((block_b, H), lambda i: (i, 0)),
        ),
        compiler_params=pltpu.CompilerParams(
            dimension_semantics=("parallel",),
            vmem_limit_bytes=vmem_limit),
        cost_estimate=cost,
    )(h, wrz, wn)

    return dh


def _reference(h, w_hr, w_hz, w_hn):
    """Pure-JAX mirror of the PyTorch forward (for correctness check)."""
    r = jax.nn.sigmoid(h @ w_hr.T)
    z = jax.nn.sigmoid(h @ w_hz.T)
    g = jnp.tanh((r * h) @ w_hn.T)
    return (1.0 - z) * (g - h)


if __name__ == "__main__":
    # Lane-dense hidden size (multiple of 128) and a batch that is NOT a
    # multiple of the chosen tile — exercises the default block_b heuristic
    # (>= 2 grid steps) and the masked ragged tail (no padding copy).
    B, H = 72, 128

    key = jax.random.PRNGKey(0)
    k_h, k_r, k_z, k_n = jax.random.split(key, 4)

    bound = 1.0 / (H ** 0.5)  # mimic PyTorch Linear init U(-1/sqrt(H), 1/sqrt(H))
    h = jax.random.normal(k_h, (B, H), dtype=jnp.float32)
    w_hr = jax.random.uniform(k_r, (H, H), jnp.float32, -bound, bound)
    w_hz = jax.random.uniform(k_z, (H, H), jnp.float32, -bound, bound)
    w_hn = jax.random.uniform(k_n, (H, H), jnp.float32, -bound, bound)

    # One-time weight prep (outside the solver loop). Use dtype=jnp.bfloat16
    # (and a bf16 h) for the fast MXU path in production.
    wrz, wn = prepare_gru_ode_weights(w_hr, w_hz, w_hn)

    dh = gru_ode_cell(h, wrz, wn)
    dh = jax.block_until_ready(dh)

    dh_ref = _reference(h, w_hr, w_hz, w_hn)
    assert dh.shape == (B, H)
    assert jnp.allclose(dh, dh_ref, atol=1e-4, rtol=1e-4), float(
        jnp.max(jnp.abs(dh - dh_ref)))

    print("KERNEL_OK")
</pallas_src>

<mosaic_0001>
module attributes {stable_mosaic.version = 11 : i64} {
  func.func @_gru_ode_kernel(%arg0: i32, %arg1: memref<32x128xf32, #tpu.memory_space<vmem>>, %arg2: memref<128x256xf32, #tpu.memory_space<vmem>>, %arg3: memref<128x128xf32, #tpu.memory_space<vmem>>, %arg4: memref<32x128xf32, #tpu.memory_space<vmem>>) attributes {dimension_semantics = [#tpu.dimension_semantics<parallel>], iteration_bounds = array<i64: 3>, scalar_prefetch = 0 : i64, scratch_operands = 0 : i64, tpu.core_type = #tpu.core_type<tc>, window_params = [{transform_indices = @transform_0, window_bounds = array<i64: 32, 128>}, {pipeline_mode = #tpu.pipeline_mode<synchronous>, transform_indices = @transform_1, window_bounds = array<i64: 128, 256>}, {pipeline_mode = #tpu.pipeline_mode<synchronous>, transform_indices = @transform_2, window_bounds = array<i64: 128, 128>}, {transform_indices = @transform_3, window_bounds = array<i64: 32, 128>}]} {
    %c0 = arith.constant 0 : index
    %c0_0 = arith.constant 0 : index
    %0 = vector.load %arg1[%c0, %c0_0] : memref<32x128xf32, #tpu.memory_space<vmem>>, vector<32x128xf32>
    %c0_1 = arith.constant 0 : index
    %c0_2 = arith.constant 0 : index
    %1 = vector.load %arg2[%c0_1, %c0_2] : memref<128x256xf32, #tpu.memory_space<vmem>>, vector<128x256xf32>
    %cst = arith.constant dense<0.000000e+00> : vector<32x256xf32>
    %2 = tpu.matmul %0, %1, %cst {dimension_numbers = #tpu.dot_dimension_numbers<[1], [0], [0], [1], [0, 0, 1, 1], [], []>} : vector<32x128xf32>, vector<128x256xf32>, vector<32x256xf32> -> vector<32x256xf32>
    %3 = vector.extract_strided_slice %2 {offsets = [0, 0], sizes = [32, 128], strides = [1, 1]} : vector<32x256xf32> to vector<32x128xf32>
    %cst_3 = arith.constant 5.000000e-01 : f32
    %4 = vector.broadcast %cst_3 : f32 to vector<32x128xf32>
    %5 = arith.mulf %4, %3 : vector<32x128xf32>
    %6 = math.tanh %5 : vector<32x128xf32>
    %cst_4 = arith.constant 5.000000e-01 : f32
    %7 = vector.broadcast %cst_4 : f32 to vector<32x128xf32>
    %8 = arith.mulf %7, %6 : vector<32x128xf32>
    %cst_5 = arith.constant 5.000000e-01 : f32
    %9 = vector.broadcast %cst_5 : f32 to vector<32x128xf32>
    %10 = arith.addf %8, %9 : vector<32x128xf32>
    %11 = vector.extract_strided_slice %2 {offsets = [0, 128], sizes = [32, 128], strides = [1, 1]} : vector<32x256xf32> to vector<32x128xf32>
    %cst_6 = arith.constant 5.000000e-01 : f32
    %12 = vector.broadcast %cst_6 : f32 to vector<32x128xf32>
    %13 = arith.mulf %12, %11 : vector<32x128xf32>
    %14 = math.tanh %13 : vector<32x128xf32>
    %cst_7 = arith.constant 5.000000e-01 : f32
    %15 = vector.broadcast %cst_7 : f32 to vector<32x128xf32>
    %16 = arith.mulf %15, %14 : vector<32x128xf32>
    %cst_8 = arith.constant 5.000000e-01 : f32
    %17 = vector.broadcast %cst_8 : f32 to vector<32x128xf32>
    %18 = arith.addf %16, %17 : vector<32x128xf32>
    %19 = arith.mulf %10, %0 : vector<32x128xf32>
    %c0_9 = arith.constant 0 : index
    %c0_10 = arith.constant 0 : index
    %20 = vector.load %arg3[%c0_9, %c0_10] : memref<128x128xf32, #tpu.memory_space<vmem>>, vector<128x128xf32>
    %cst_11 = arith.constant dense<0.000000e+00> : vector<32x128xf32>
    %21 = tpu.matmul %19, %20, %cst_11 {dimension_numbers = #tpu.dot_dimension_numbers<[1], [0], [0], [1], [0, 0, 1, 1], [], []>} : vector<32x128xf32>, vector<128x128xf32>, vector<32x128xf32> -> vector<32x128xf32>
    %22 = math.tanh %21 : vector<32x128xf32>
    %cst_12 = arith.constant 1.000000e+00 : f32
    %23 = vector.broadcast %cst_12 : f32 to vector<32x128xf32>
    %24 = arith.subf %23, %18 : vector<32x128xf32>
    %25 = arith.subf %22, %0 : vector<32x128xf32>
    %26 = arith.mulf %24, %25 : vector<32x128xf32>
    %c0_13 = arith.constant 0 : index
    %c0_14 = arith.constant 0 : index
    %27 = vector.load %arg4[%c0_13, %c0_14] : memref<32x128xf32, #tpu.memory_space<vmem>>, vector<32x128xf32>
    tpu.vector_store %arg4[%c0_13, %c0_14], %26 {strides = array<i32>} : memref<32x128xf32, #tpu.memory_space<vmem>>, vector<32x128xf32>,
    return
  }
  func.func @transform_0(%arg0: i32) -> (i32, i32) {
    %c0_i32 = arith.constant 0 : i32
    %c0_i32_0 = arith.constant 0 : i32
    return %arg0, %c0_i32 : i32, i32
  }
  func.func @transform_1(%arg0: i32) -> (i32, i32) {
    %c0_i32 = arith.constant 0 : i32
    %c0_i32_0 = arith.constant 0 : i32
    %c0_i32_1 = arith.constant 0 : i32
    return %c0_i32, %c0_i32_0 : i32, i32
  }
  func.func @transform_2(%arg0: i32) -> (i32, i32) {
    %c0_i32 = arith.constant 0 : i32
    %c0_i32_0 = arith.constant 0 : i32
    %c0_i32_1 = arith.constant 0 : i32
    return %c0_i32, %c0_i32_0 : i32, i32
  }
  func.func @transform_3(%arg0: i32) -> (i32, i32) {
    %c0_i32 = arith.constant 0 : i32
    %c0_i32_0 = arith.constant 0 : i32
    return %arg0, %c0_i32 : i32, i32
  }
}

</mosaic_0001>

<bundles_post_ra>
// kernel: gru_ode_cell.1
= control target key start
LH: loop header
LB: loop body
LE: loop exit
PB: predicated region body
PF: predicated region fallthrough
CT: control target
= control target key end

     0   :  { %8 = vsyncpa [#allocation3], 0  ;;  %s1336_s0 = inlined_call_operand.hbm [shape: f32[72,128], index: 0, kind: input, shape index: {}]   ;;  %s1337_s1 = inlined_call_operand.hbm [shape: f32[128,256], index: 1, kind: input, shape index: {}]   ;;  %s1338_s2 = inlined_call_operand.hbm [shape: f32[128,128], index: 2, kind: input, shape index: {}]   ;;  %s1339_s3 = inlined_call_operand.hbm [shape: f32[72,128], index: 3, kind: output, shape index: {}]  }
   0x1   :  { %10 = vsyncpa [#allocation3 + $0x1], 0 }
   0x2   :  { %11 = vsyncpa [#allocation6], 0 }
   0x3   :  { %12 = vsyncpa [#allocation4], 0 }
   0x4   :  { %14 = vsyncpa [#allocation4 + $0x1], 0  ;;  %s1060_s12 = smov 0   ;;  %s1062_s13 = smov 0  }
   0x5   :  { %s1064_s14 = smov 0   ;;  %s1066_s15 = smov 0  }
   0x6 LB: > { %s1081_s16 = sadd.s32 4294967295, %s1025_s15   ;;  %s628_s17 = sadd.s32 4294967294, %s1025_s15   ;;  %s1025_s15 = sphi %s1066_s15, %s1359_s15   ;;  %s1021_s14 = sphi %s1064_s14, %s1358_s14   ;;  %s1017_s13 = sphi %s1062_s13, %s1357_s13   ;;  %s1013_s12 = sphi %s1060_s12, %s1356_s12  }
   0x7   : > { %s1085_s18 = sadd.s32 1, %s1025_s15   ;;  %s27_s19 = sadd.s32 1, %s1021_s14 }
   0x8   : > { %s24_s20 = ssub.s32 %s1025_s15, %s1085_s18  ;;  %p34_p0 = scmp.ne.s32.totalorder %s1021_s14, %s1017_s13 }
   0x9   : > { %p25_p1 = scmp.eq.s32.totalorder %s24_s20, 0  ;;  %p35_p2 = scmp.eq.s32.totalorder %s1025_s15, 0 }
   0xa   : > { %p40_p3 = scmp.ne.s32.totalorder %s1017_s13, %s1013_s12  ;;  %p1340_p4 = scmp.eq.s32.totalorder %s1081_s16, 0 }
   0xb   : > { %s1097_s21 = scalar_select %p25_p1, %s1021_s14, %s27_s19  }
   0xc   : > { %p1099_p5 = por %p35_p2, %p34_p0  ;;  %p1105_p6 = por %p1340_p4, %p40_p3 }
   0xd   : > { %p106_p7 = scmp.eq.s32.totalorder %s1081_s16, 2  ;;  %p112_p8 = scmp.eq.s32.totalorder %s628_s17, 2 }
   0xe   : > { %s1343_s22 = scalar_select %p1099_p5, 1, 0 }
   0xf   : > { %s1344_s23 = scalar_select %p1105_p6, 1, 0 }
  0x10   : > { %p629_p9 = scmp.ge.s32.totalorder %s1025_s15, 1  ;;  %p119_p10 = scmp.lt.s32.totalorder %s1025_s15, 4 }
  0x11   : > { %p1112_p11 = por %p106_p7, %p34_p0  ;;  %p1116_p12 = por %p112_p8, %p40_p3 }
  0x12   : > { %p1120_p13 = pnand %p629_p9, %p119_p10  ;;  %s1027_s27 = smov [#allocation5]  }
  0x13   : > { %s1345_s24 = scalar_select %p1112_p11, 1, 0 }
  0x14   : > { %s1346_s25 = scalar_select %p1116_p12, 1, 0 }
  0x15   : > { %s1347_s26 = scalar_select %p1120_p13, 1, 0 }
  0x16   : > { %p788_p1 = pneg %p1120_p13  ;;  %s131_s28 = sshll.u32 %s1027_s27, 4  ;;  %s132_s28 = int_to_ptr.vmem [resolvable:$true] %s131_s28 }
  0x17   : > { %s1028_s30 = smov [#allocation7]   ;;  %s871_s7 = scalar_lea.hbm %s1337_s1, 4096 }
  0x18   : > { %p1128_p2 = pnand %p788_p1, %p1340_p4  ;;  %s144_s4 = sshll.u32 %s1028_s30, 4  ;;  %s1132_s4 = int_to_ptr.vmem [resolvable:$true] %s144_s4 }
  0x19   : > { %p872_p0 = scmp.ne.s32.totalorder %s1337_s1, %s871_s7  ;;  %p878_p9 = scmp.lt.u32.totalorder %s871_s7, %s1337_s1 }
  0x1a   : > { %p873_p3 = pneg %p1128_p2 }
  0x1c   : > { %p874_p7 = pnand %p873_p3, %p872_p0 }
  0x1e   : > { %p875_p8 = pneg %p874_p7 }
  0x20   : > { %p880_p10 = pnand %p878_p9, %p875_p8 }
  0x22   : > { %883 = shalt.err (!%p880_p10)
}
  0x23   : > { %s884_s17 = scalar_lea.vmem %s132_s28, 4096  ;;  %p892_p11 = scmp.lt.s32.totalorder %s132_s28, %s132_s28 }
  0x24   : > { %p885_p1 = scmp.ne.s32.totalorder %s132_s28, %s884_s17  ;;  %p893_p6 = scmp.lt.s32.totalorder %s884_s17, %s884_s17 }
  0x26   : > { %p887_p4 = pnand %p885_p1, %p873_p3  ;;  %p894_p13 = por %p893_p6, %p892_p11 }
  0x28   : > { %p888_p12 = pneg %p887_p4 }
  0x2a   : > { %p895_p5 = pnand %p894_p13, %p888_p12 }
  0x2c   : > { %898 = shalt.err (!%p895_p5)
}
  0x2d   : > { %s1029_s19 = smov 256   ;;  %s1030_s20 = smov 16  }
  0x2e   : > { %791 = dma.hbm_to_vmem [thread:$0]  (!%p1128_p2), %s1337_s1, 4096, %s132_s28, [#allocation6], %s1029_s19, %s1029_s19, %s1030_s20  }
  0x2f   : > { %s899_s7 = scalar_lea.hbm %s1338_s2, 2048 }
  0x30   : > { %p900_p4 = scmp.ne.s32.totalorder %s1338_s2, %s899_s7  ;;  %p906_p11 = scmp.lt.u32.totalorder %s899_s7, %s1338_s2 }
  0x32   : > { %p902_p5 = pnand %p900_p4, %p873_p3 }
  0x34   : > { %p903_p6 = pneg %p902_p5 }
  0x36   : > { %p908_p12 = pnand %p906_p11, %p903_p6 }
  0x38   : > { %911 = shalt.err (!%p908_p12)
}
  0x39   : > { %s912_s28 = scalar_lea.vmem %s1132_s4, 2048  ;;  %p920_p8 = scmp.lt.s32.totalorder %s1132_s4, %s1132_s4 }
  0x3a   : > { %p913_p13 = scmp.ne.s32.totalorder %s1132_s4, %s912_s28  ;;  %p921_p9 = scmp.lt.s32.totalorder %s912_s28, %s912_s28 }
  0x3c   : > { %p915_p0 = pnand %p913_p13, %p873_p3  ;;  %p922_p10 = por %p921_p9, %p920_p8 }
  0x3e   : > { %p916_p7 = pneg %p915_p0 }
  0x40   : > { %p923_p1 = pnand %p922_p10, %p916_p7 }
  0x42   : > { %926 = shalt.err (!%p923_p1)
}
  0x43   : > { %s1031_s17 = smov 128   ;;  %s1032_s19 = smov 8  }
  0x44   : > { %794 = dma.hbm_to_vmem [thread:$0]  (!%p1128_p2), %s1338_s2, 2048, %s1132_s4, [#allocation6], %s1031_s17, %s1031_s17, %s1032_s19  }
  0x45   : > { %p632_p4 = scmp.ge.s32.totalorder %s1025_s15, 3 }
  0x46   : > { %p1349_p3 = scmp.ne.s32.totalorder (!%p632_p4), %s1343_s22, 0 }
  0x47   : > { %154 = sbr.rel (%p632_p4) target bundleno = 113 (0x71), region = 24 }
  0x4e   : > { %157 = sbr.rel (!%p1349_p3) target bundleno = 113 (0x71), region = 28  ;;  %s158_s30 = sand.u32 (%p1349_p3), 1, %s1021_s14  }
  0x4f   : > { %s634_s5 = sshll.u32 (%p1349_p3), %s1025_s15, 2  ;;  %s633_s6 = sshll.u32 (%p1349_p3), %s158_s30, 5 }
  0x50   : > { %s164_s7 = ssub.s32 (%p1349_p3), 9, %s634_s5  ;;  %s1189_s9 = scalar_lea.sflag (%p1349_p3), [#allocation3], %s158_s30 }
  0x51   : > { %p165_p5 = scmp.lt.s32.totalorder (%p1349_p3), %s164_s7, 4  ;;  %s162_s4 = scalar_lea.vmem (%p1349_p3), [#allocation2], %s633_s6 }
  0x55   : > { %s1361_s7 = smov (!%p165_p5, %s164_s7), 4 }
  0x56   : > { %s1186_s8 = sshll.u32 %s1361_s7, 7 }
  0x57   : > { %s169_s29 = ssub.s32 512, %s1186_s8 }
  0x58   : > { %170 = vsyncadd %s1189_s9, %s169_s29  ;;  %p636_p2 = scmp.ne.s32.totalorder %s1186_s8, 0  ;;  %s654_s22 = sshll.u32 %s1025_s15, 9 }
  0x59   : > { %s1197_s28 = scalar_lea.hbm %s1336_s0, %s654_s22  ;;  %s175_s17 = sshll.u32 %s162_s4, 4  ;;  %s1199_s17 = int_to_ptr.vmem [resolvable:$true] %s175_s17 }
  0x5a   : > { %s927_s19 = scalar_lea.hbm %s1197_s28, %s1186_s8  ;;  %s931_s30 = scalar_lea.hbm %s1336_s0, 1152 }
  0x5b   : > { %p928_p6 = scmp.ne.s32.totalorder %s1197_s28, %s927_s19  ;;  %p932_p13 = scmp.lt.u32.totalorder %s1197_s28, %s1336_s0 }
  0x5c   : > { %p933_p0 = scmp.lt.u32.totalorder %s931_s30, %s927_s19  ;;  %p935_p8 = scmp.lt.u32.totalorder %s927_s19, %s1197_s28 }
  0x5d   : > { %p929_p11 = pnand %p928_p6, %p636_p2 }
  0x5e   : > { %p934_p7 = por %p933_p0, %p932_p13 }
  0x5f   : > { %p930_p12 = pneg %p929_p11 }
  0x60   : > { %p936_p9 = por %p935_p8, %p934_p7 }
  0x62   : > { %p937_p10 = pnand %p936_p9, %p930_p12 }
  0x64   : > { %940 = shalt.err (!%p937_p10)
}
  0x65   : > { %s941_s7 = scalar_lea.vmem %s1199_s17, %s1186_s8  ;;  %s1033_s29 = smov [#allocation2]  }
  0x66   : > { %p942_p1 = scmp.ne.s32.totalorder %s1199_s17, %s941_s7  ;;  %s945_s4 = sshll.u32 %s1033_s29, 4  ;;  %s946_s4 = int_to_ptr.vmem [resolvable:$false] %s945_s4 }
  0x67   : > { %s947_s22 = scalar_lea.vmem %s946_s4, 1024  ;;  %p948_p5 = scmp.lt.s32.totalorder %s1199_s17, %s946_s4 }
  0x68   : > { %p943_p4 = pnand %p942_p1, %p636_p2  ;;  %p949_p6 = scmp.lt.s32.totalorder %s947_s22, %s941_s7 }
  0x6a   : > { %p944_p3 = pneg %p943_p4  ;;  %p950_p11 = por %p949_p6, %p948_p5 }
  0x6c   : > { %p951_p13 = pnand %p950_p11, %p944_p3 }
  0x6e   : > { %954 = shalt.err (!%p951_p13)
}
  0x6f   : > { %s1034_s10 = smov 128   ;;  %s1035_s11 = smov 8  }
  0x70   : > { %181 = dma.hbm_to_vmem [thread:$0]  (%p636_p2), %s1197_s28, %s1186_s8, %s1199_s17, %s1189_s9, %s1034_s10, %s1034_s10, %s1035_s11  }
  0x71 PF: > { %p1350_p12 = scmp.ne.s32.totalorder %s1347_s26, 0 }
  0x72   : > { %s1229_s19 = sand.u32 (!%p1350_p12), 1, %s1017_s13   ;;  %p1351_p0 = scmp.ne.s32.totalorder (!%p1350_p12), %s1344_s23, 0 }
  0x73   : > { %187 = sbr.rel (%p1350_p12) target bundleno = 661 (0x295), region = 32  ;;  %s641_s20 = sshll.u32 (!%p1350_p12), %s1229_s19, 5 }
  0x74   : > { %s190_s27 = scalar_lea.sflag (!%p1350_p12), [#allocation3], %s1229_s19  ;;  %s1235_s30 = scalar_lea.vmem (!%p1350_p12), [#allocation2], %s641_s20 }
  0x7a   : > { %1000 = dma.done.wait (%p1351_p0), %s190_s27, 512  }
  0x7b   : > { %1002 = vsyncadd (%p1351_p0), %s190_s27, 4294966784  ;;  %p1352_p2 = scmp.eq.s32.totalorder %s1081_s16, 0 }
  0x7d   : > { %1004 = dma.done.wait (%p1352_p2), [#allocation6], 6144   ;;  %p1353_p7 = pmov %p1352_p2 }
  0x7e   : > { %v1036_v0 = vmov 0.0   ;;  %v239_v1 = vld [vmem:[#allocation5 + $0x8] sm:$0xff]  ;;  %v241_v2 = vld [vmem:[#allocation5 + $0x18] sm:$0xff]  ;;  %v238_v3 = vld [vmem:[#allocation5] sm:$0xff]  ;;  %s223_s23 = scalar_lea.vmem [#allocation8], %s641_s20  ;;  %s517_s26 = scalar_lea.sflag [#allocation4], %s1229_s19 }
  0x7f   : > { %1006 = vsyncadd (%p1353_p7), [#allocation6], 4294961152  ;;  %334 = vmatprep.mubr.f32.mxu0 %v1036_v0  ;;  %v714_v4 = vpack.c.bf16 %v241_v2, %v239_v1  ;;  %v240_v5 = vld [vmem:[#allocation5 + $0x10] sm:$0xff]  ;;  %v243_v6 = vld [vmem:[#allocation5 + $0x28] sm:$0xff]  ;;  %p1354_p8 = scmp.ne.s32.totalorder %s1345_s24, 0 }
  0x80   : > { %v245_v7 = vld [vmem:[#allocation5 + $0x38] sm:$0xff]  ;;  %v716_v8 = vpack.c.bf16 %v240_v5, %v238_v3  ;;  %v242_v10 = vld [vmem:[#allocation5 + $0x20] sm:$0xff]  ;;  %v244_v11 = vld [vmem:[#allocation5 + $0x30] sm:$0xff]  ;;  %s646_s8 = sshll.u32 (%p1354_p8), %s1081_s16, 2 }
  0x81   : > { %v718_v9 = vpack.c.bf16 %v245_v7, %v243_v6  ;;  %v247_v12 = vld [vmem:[#allocation5 + $0x48] sm:$0xff]  ;;  %715 = vmatprep.subr.bf16.mxu0 %v714_v4  ;;  %v249_v13 = vld [vmem:[#allocation5 + $0x58] sm:$0xff]  ;;  %v720_v14 = vpack.c.bf16 %v244_v11, %v242_v10  ;;  %v246_v16 = vld [vmem:[#allocation5 + $0x40] sm:$0xff]  ;;  %s525_s9 = ssub.s32 (%p1354_p8), 9, %s646_s8 }
  0x82   : > { %717 = vmatpush1.bf16.msra.mxu0 %v716_v8  ;;  %v722_v15 = vpack.c.bf16 %v249_v13, %v247_v12  ;;  %v248_v17 = vld [vmem:[#allocation5 + $0x50] sm:$0xff]  ;;  %v251_v18 = vld [vmem:[#allocation5 + $0x68] sm:$0xff]  ;;  %v253_v19 = vld [vmem:[#allocation5 + $0x78] sm:$0xff]  ;;  %p526_p9 = scmp.lt.s32.totalorder (%p1354_p8), %s525_s9, 4 }
  0x83   : > { %719 = vmatprep.subr.bf16.mxu0 %v718_v9  ;;  %v724_v20 = vpack.c.bf16 %v248_v17, %v246_v16  ;;  %v726_v21 = vpack.c.bf16 %v253_v19, %v251_v18  ;;  %v250_v22 = vld [vmem:[#allocation5 + $0x60] sm:$0xff]  ;;  %v252_v23 = vld [vmem:[#allocation5 + $0x70] sm:$0xff]  ;;  %v255_v24 = vld [vmem:[#allocation5 + $0x88] sm:$0xff] }
  0x84   : > { %v257_v25 = vld [vmem:[#allocation5 + $0x98] sm:$0xff]  ;;  %v728_v26 = vpack.c.bf16 %v252_v23, %v250_v22  ;;  %v395_v27 = vld [vmem:[#allocation7] sm:$0xff]  ;;  %v396_v28 = vld [vmem:[#allocation7 + $0x8] sm:$0xff] }
  0x85   : > { %v397_v29 = vld [vmem:[#allocation7 + $0x10] sm:$0xff]  ;;  %v730_v30 = vpack.c.bf16 %v257_v25, %v255_v24  ;;  %v254_v31 = vld [vmem:[#allocation5 + $0x80] sm:$0xff]  ;;  %v746_v33 = vpack.c.bf16 %v396_v28, %v395_v27  ;;  %v398_v34 = vld [vmem:[#allocation7 + $0x18] sm:$0xff] }
  0x86   : > { %721 = vmatpush1.bf16.msra.mxu0 %v720_v14  ;;  %v256_v32 = vld [vmem:[#allocation5 + $0x90] sm:$0xff]  ;;  %v259_v35 = vld [vmem:[#allocation5 + $0xa8] sm:$0xff]  ;;  %v261_v36 = vld [vmem:[#allocation5 + $0xb8] sm:$0xff]  ;;  %v750_v37 = vpack.c.bf16 %v398_v34, %v397_v29 }
  0x87   : > { %723 = vmatprep.subr.bf16.mxu0 %v722_v15  ;;  %747 = vmatprep.subr.bf16.mxu1 %v746_v33  ;;  %v732_v38 = vpack.c.bf16 %v256_v32, %v254_v31  ;;  %v734_v39 = vpack.c.bf16 %v261_v36, %v259_v35  ;;  %v258_v40 = vld [vmem:[#allocation5 + $0xa0] sm:$0xff]  ;;  %v260_v41 = vld [vmem:[#allocation5 + $0xb0] sm:$0xff]  ;;  %v263_v42 = vld [vmem:[#allocation5 + $0xc8] sm:$0xff] }
  0x88   : > { %749 = vmatpush3.bf16.msra.mxu1 %v746_v33  ;;  %v265_v43 = vld [vmem:[#allocation5 + $0xd8] sm:$0xff]  ;;  %v736_v44 = vpack.c.bf16 %v260_v41, %v258_v40  ;;  %v262_v46 = vld [vmem:[#allocation5 + $0xc0] sm:$0xff]  ;;  %v264_v47 = vld [vmem:[#allocation5 + $0xd0] sm:$0xff] }
  0x89   : > { %751 = vmatprep.subr.bf16.mxu1 %v750_v37  ;;  %v738_v45 = vpack.c.bf16 %v265_v43, %v263_v42  ;;  %v267_v48 = vld [vmem:[#allocation5 + $0xe8] sm:$0xff]  ;;  %v269_v49 = vld [vmem:[#allocation5 + $0xf8] sm:$0xff]  ;;  %v740_v50 = vpack.c.bf16 %v264_v47, %v262_v46  ;;  %v266_v52 = vld [vmem:[#allocation5 + $0xe0] sm:$0xff] }
  0x8a   : > { %725 = vmatpush1.bf16.msra.mxu0 %v724_v20  ;;  %v742_v51 = vpack.c.bf16 %v269_v49, %v267_v48  ;;  %v268_v53 = vld [vmem:[#allocation5 + $0xf0] sm:$0xff]  ;;  %v1247_v55 = vld [vmem:[%s1235_s30] sm:$0xff]  ;;  %v1252_v56 = vld [vmem:[%s1235_s30 + $0x8] sm:$0xff] }
  0x8b   : > { %727 = vmatprep.subr.bf16.mxu0 %v726_v21  ;;  %v744_v54 = vpack.c.bf16 %v268_v53, %v266_v52  ;;  %v1257_v57 = vld [vmem:[%s1235_s30 + $0x10] sm:$0xff]  ;;  %v1262_v58 = vld [vmem:[%s1235_s30 + $0x18] sm:$0xff]  ;;  %v399_v59 = vld [vmem:[#allocation7 + $0x20] sm:$0xff] }
  0x8c   : > { %753 = vmatpush3.bf16.msra.mxu1 %v750_v37  ;;  %v400_v60 = vld [vmem:[#allocation7 + $0x28] sm:$0xff]  ;;  %v401_v62 = vld [vmem:[#allocation7 + $0x30] sm:$0xff]  ;;  %v402_v63 = vld [vmem:[#allocation7 + $0x38] sm:$0xff] }
  0x8d   : > { %v754_v61 = vpack.c.bf16 %v400_v60, %v399_v59  ;;  %v758_v1 = vpack.c.bf16 %v402_v63, %v401_v62  ;;  %v403_v2 = vld [vmem:[#allocation7 + $0x40] sm:$0xff]  ;;  %v404_v3 = vld [vmem:[#allocation7 + $0x48] sm:$0xff]  ;;  %v406_v5 = vld [vmem:[#allocation7 + $0x58] sm:$0xff] }
  0x8e   : > { %729 = vmatpush1.bf16.msra.mxu0 %v728_v26  ;;  %v762_v4 = vpack.c.bf16 %v404_v3, %v403_v2  ;;  %v407_v7 = vld [vmem:[#allocation7 + $0x60] sm:$0xff]  ;;  %v408_v8 = vld [vmem:[#allocation7 + $0x68] sm:$0xff]  ;;  %v409_v10 = vld [vmem:[#allocation7 + $0x70] sm:$0xff] }
  0x8f   : > { %731 = vmatprep.subr.bf16.mxu0 %v730_v30  ;;  %755 = vmatprep.subr.bf16.mxu1 %v754_v61  ;;  %v770_v9 = vpack.c.bf16 %v408_v8, %v407_v7  ;;  %v410_v11 = vld [vmem:[#allocation7 + $0x78] sm:$0xff] }
  0x90   : > { %757 = vmatpush3.bf16.msra.mxu1 %v754_v61  ;;  %v774_v12 = vpack.c.bf16 %v410_v11, %v409_v10 }
  0x91   : > { %759 = vmatprep.subr.bf16.mxu1 %v758_v1 }
  0x92   : > { %733 = vmatpush1.bf16.msra.mxu0 %v732_v38 }
  0x93   : > { %735 = vmatprep.subr.bf16.mxu0 %v734_v39 }
  0x94   : > { %761 = vmatpush3.bf16.msra.mxu1 %v758_v1 }
  0x95   : > { %763 = vmatprep.subr.bf16.mxu1 %v762_v4 }
  0x96   : > { %737 = vmatpush1.bf16.msra.mxu0 %v736_v44 }
  0x97   : > { %739 = vmatprep.subr.bf16.mxu0 %v738_v45 }
  0x98   : > { %765 = vmatpush3.bf16.msra.mxu1 %v762_v4 }
  0x9a   : > { %741 = vmatpush1.bf16.msra.mxu0 %v740_v50 }
  0x9b   : > { %743 = vmatprep.subr.bf16.mxu0 %v742_v51 }
  0x9e   : > { %745 = vmatpush1.bf16.msra.mxu0 %v744_v54 }
  0xa1   : > { %335 = vmatmul.mubr.f32.vlgmr.msra.gmra.mrb[0].mxu0 %v1247_v55 }
  0xa2   : > { %340 = vmatprep.mubr.f32.mxu0 %v1036_v0 }
  0xa5   : > { %341 = vmatmul.mubr.f32.gmra.mrb[2].mxu0 %v1252_v56 }
  0xa6   : > { %346 = vmatprep.mubr.f32.mxu0 %v1036_v0 }
  0xa9   : > { %347 = vmatmul.mubr.f32.gmra.mrb[4].mxu0 %v1257_v57 }
  0xaa   : > { %352 = vmatprep.mubr.f32.mxu0 %v1036_v0  ;;  %v405_v0 = vld [vmem:[#allocation7 + $0x50] sm:$0xff] }
  0xab   : > { %v766_v6 = vpack.c.bf16 %v406_v5, %v405_v0 }
  0xad   : > { %353 = vmatmul.mubr.f32.gmra.mrb[6].mxu0 %v1262_v58  ;;  %767 = vmatprep.subr.bf16.mxu1 %v766_v6 }
  0xae   : > { %769 = vmatpush3.bf16.msra.mxu1 %v766_v6 }
  0xaf   : > { %771 = vmatprep.subr.bf16.mxu1 %v770_v9 }
  0xb2   : > { %773 = vmatpush3.bf16.msra.mxu1 %v770_v9 }
  0xb3   : > { %775 = vmatprep.subr.bf16.mxu1 %v774_v12 }
  0xb6   : > { %777 = vmatpush3.bf16.msra.mxu1 %v774_v12 }
 0x174   : > { %v336_v13 = vpop.f32.mrb[0].mxu0 }
 0x175   : > { %v359_v14 = vmul.f32 0.5, %v336_v13  ;;  %v338_v15 = vpop.f32.mrb[1].mxu0 }
 0x176   : > { %v375_v42 = vmul.f32 0.5, %v338_v15 }
 0x177   : > { %847 = vtanh.f32 %v359_v14 }
 0x178   : > { %v342_v16 = vpop.f32.mrb[2].mxu0 }
 0x179   : > { %v360_v17 = vmul.f32 0.5, %v342_v16  ;;  %v344_v18 = vpop.f32.mrb[3].mxu0 }
 0x17a   : > { %v376_v41 = vmul.f32 0.5, %v344_v18 }
 0x17b   : > { %849 = vtanh.f32 %v360_v17 }
 0x17c   : > { %v348_v19 = vpop.f32.mrb[4].mxu0 }
 0x17d   : > { %v361_v20 = vmul.f32 0.5, %v348_v19  ;;  %v350_v21 = vpop.f32.mrb[5].mxu0 }
 0x17e   : > { %v377_v44 = vmul.f32 0.5, %v350_v21 }
 0x17f   : > { %851 = vtanh.f32 %v361_v20 }
 0x180   : > { %v354_v22 = vpop.f32.mrb[6].mxu0 }
 0x181   : > { %v848_v23 = vpop.eup %847  ;;  %v362_v24 = vmul.f32 0.5, %v354_v22  ;;  %v356_v25 = vpop.f32.mrb[7].mxu0 }
 0x182   : > { %v367_v26 = vmul.f32 0.5, %v848_v23  ;;  %v378_v43 = vmul.f32 0.5, %v356_v25 }
 0x183   : > { %853 = vtanh.f32 %v362_v24 }
 0x184   : > { %v371_v27 = vadd.f32 0.5, %v367_v26  ;;  %855 = vtanh.f32 %v376_v41 }
 0x185   : > { %v850_v28 = vpop.eup %849  ;;  %857 = vtanh.f32 %v375_v42 }
 0x186   : > { %v368_v29 = vmul.f32 0.5, %v850_v28  ;;  %v391_v30 = vmul.f32 %v371_v27, %v1247_v55  ;;  %859 = vtanh.f32 %v378_v43 }
 0x187   : > { %861 = vtanh.f32 %v377_v44 }
 0x188   : > { %v372_v31 = vadd.f32 0.5, %v368_v29  ;;  %708 = vmatprep.mubr.f32.mxu1 %v391_v30 }
 0x189   : > { %v852_v32 = vpop.eup %851 }
 0x18a   : > { %v369_v33 = vmul.f32 0.5, %v852_v32  ;;  %v392_v34 = vmul.f32 %v372_v31, %v1252_v56 }
 0x18c   : > { %v373_v35 = vadd.f32 0.5, %v369_v33  ;;  %709 = vmatmul.mubr.f32.vlgmr.msra.gmra.mrb[0].mxu1 %v392_v34 }
 0x18d   : > { %v854_v36 = vpop.eup %853 }
 0x18e   : > { %v370_v37 = vmul.f32 0.5, %v854_v36  ;;  %v393_v38 = vmul.f32 %v373_v35, %v1257_v57  ;;  %v856_v46 = vpop.eup %855 }
 0x18f   : > { %v858_v48 = vpop.eup %857  ;;  %v384_v49 = vmul.f32 0.5, %v856_v46 }
 0x190   : > { %v374_v39 = vadd.f32 0.5, %v370_v37  ;;  %711 = vmatprep.mubr.f32.mxu1 %v393_v38  ;;  %v383_v50 = vmul.f32 0.5, %v858_v48  ;;  %v860_v53 = vpop.eup %859 }
 0x191   : > { %v388_v51 = vadd.f32 0.5, %v384_v49  ;;  %v862_v60 = vpop.eup %861  ;;  %v386_v1 = vmul.f32 0.5, %v860_v53 }
 0x192   : > { %v394_v40 = vmul.f32 %v374_v39, %v1262_v58  ;;  %v387_v54 = vadd.f32 0.5, %v383_v50  ;;  %v385_v4 = vmul.f32 0.5, %v862_v60 }
 0x193   : > { %v501_v63 = vsub.f32 1.0, %v388_v51  ;;  %v390_v7 = vadd.f32 0.5, %v386_v1 }
 0x194   : > { %712 = vmatmul.mubr.f32.gmra.mrb[2].mxu1 %v394_v40  ;;  %v500_v3 = vsub.f32 1.0, %v387_v54  ;;  %v389_v8 = vadd.f32 0.5, %v385_v4 }
 0x195   : > { %v503_v11 = vsub.f32 1.0, %v390_v7 }
 0x196   : > { %v502_v13 = vsub.f32 1.0, %v389_v8 }
 0x25f   : > { %v710_v45 = vpop.f32.mrb[0].mxu1 }
 0x260   : > { %863 = vtanh.f32 %v710_v45  ;;  %v477_v47 = vpop.f32.mrb[1].mxu1 }
 0x261   : > { %865 = vtanh.f32 %v477_v47 }
 0x267   : > { %v713_v52 = vpop.f32.mrb[2].mxu1 }
 0x268   : > { %867 = vtanh.f32 %v713_v52  ;;  %v487_v59 = vpop.f32.mrb[3].mxu1 }
 0x269   : > { %869 = vtanh.f32 %v487_v59 }
 0x26a   : > { %v864_v61 = vpop.eup %863 }
 0x26b   : > { %v866_v62 = vpop.eup %865  ;;  %v505_v2 = vsub.f32 %v864_v61, %v1252_v56 }
 0x26c   : > { %v504_v0 = vsub.f32 %v866_v62, %v1247_v55 }
 0x26d   : > { %v509_v5 = vmul.f32 %v505_v2, %v501_v63 }
 0x26e   : > { %v508_v6 = vmul.f32 %v504_v0, %v500_v3 }
 0x26f   : > { %513 = vst [vmem:[%s223_s23 + $0x8] sm:$0xff] %v509_v5 }
 0x270   : > { %512 = vst [vmem:[%s223_s23] sm:$0xff] %v508_v6 }
 0x272   : > { %v868_v9 = vpop.eup %867  ;;  %523 = sbr.rel (!%p1354_p8) target bundleno = 661 (0x295), region = 48 }
 0x273   : > { %v870_v10 = vpop.eup %869  ;;  %v507_v12 = vsub.f32 %v868_v9, %v1262_v58 }
 0x274   : > { %v506_v56 = vsub.f32 %v870_v10, %v1257_v57 }
 0x275   : > { %v511_v14 = vmul.f32 %v507_v12, %v503_v11 }
 0x276   : > { %v510_v15 = vmul.f32 %v506_v56, %v502_v13 }
 0x277   : > { %515 = vst [vmem:[%s223_s23 + $0x18] sm:$0xff] %v511_v14 }
 0x278   : > { %514 = vst [vmem:[%s223_s23 + $0x10] sm:$0xff] %v510_v15 }
 0x279   : > { %s1363_s9 = smov (!%p526_p9, %s525_s9), 4 }
 0x27a   : > { %s1279_s28 = sshll.u32 %s1363_s9, 7 }
 0x27b   : > { %s530_s17 = ssub.s32 512, %s1279_s28 }
 0x27c   : > { %531 = vsyncadd %s517_s26, %s530_s17  ;;  %p648_p10 = scmp.ne.s32.totalorder %s1279_s28, 0  ;;  %s655_s5 = sshll.u32 %s1081_s16, 9 }
 0x27d   : > { %s1289_s7 = scalar_lea.hbm %s1339_s3, %s655_s5  ;;  %s536_s29 = sshll.u32 %s223_s23, 4  ;;  %s1291_s29 = int_to_ptr.vmem [resolvable:$true] %s536_s29 }
 0x27e   : > { %s955_s4 = scalar_lea.vmem %s1291_s29, %s1279_s28  ;;  %s1037_s22 = smov [#allocation8]  }
 0x27f   : > { %p956_p1 = scmp.ne.s32.totalorder %s1291_s29, %s955_s4  ;;  %s959_s10 = sshll.u32 %s1037_s22, 4  ;;  %s960_s10 = int_to_ptr.vmem [resolvable:$false] %s959_s10 }
 0x280   : > { %s961_s16 = scalar_lea.vmem %s960_s10, 1024  ;;  %p962_p5 = scmp.lt.s32.totalorder %s1291_s29, %s960_s10 }
 0x281   : > { %p957_p4 = pnand %p956_p1, %p648_p10  ;;  %p963_p6 = scmp.lt.s32.totalorder %s961_s16, %s955_s4 }
 0x283   : > { %p958_p3 = pneg %p957_p4  ;;  %p964_p11 = por %p963_p6, %p962_p5 }
 0x285   : > { %p965_p13 = pnand %p964_p11, %p958_p3 }
 0x287   : > { %968 = shalt.err (!%p965_p13)
}
 0x288   : > { %s969_s11 = scalar_lea.hbm %s1289_s7, %s1279_s28  ;;  %s973_s30 = scalar_lea.hbm %s1339_s3, 1152 }
 0x289   : > { %p970_p12 = scmp.ne.s32.totalorder %s1289_s7, %s969_s11  ;;  %p974_p7 = scmp.lt.u32.totalorder %s1289_s7, %s1339_s3 }
 0x28a   : > { %p975_p8 = scmp.lt.u32.totalorder %s973_s30, %s969_s11  ;;  %p977_p1 = scmp.lt.u32.totalorder %s969_s11, %s1289_s7 }
 0x28b   : > { %p971_p0 = pnand %p970_p12, %p648_p10 }
 0x28c   : > { %p976_p9 = por %p975_p8, %p974_p7 }
 0x28d   : > { %p972_p2 = pneg %p971_p0 }
 0x28e   : > { %p978_p4 = por %p977_p1, %p976_p9 }
 0x290   : > { %p979_p3 = pnand %p978_p4, %p972_p2 }
 0x292   : > { %982 = shalt.err (!%p979_p3)
}
 0x293   : > { %s1038_s9 = smov 128   ;;  %s1039_s17 = smov 8  }
 0x294   : > { %542 = dma.vmem_to_hbm [thread:$0]  (%p648_p10), %s1291_s29, %s1279_s28, %s1289_s7, %s517_s26, %s1038_s9, %s1038_s9, %s1039_s17  }
 0x295 PF: > { %p803_p5 = scmp.ge.s32.totalorder %s1025_s15, 2  ;;  %s551_s5 = sand.u32 1, %s1013_s12  }
 0x296   : > { %p1355_p6 = scmp.ne.s32.totalorder %s1346_s25, 0  ;;  %s552_s24 = scalar_lea.sflag [#allocation4], %s551_s5 }
 0x298   : > { %p796_p11 = pnand %p803_p5, %p1355_p6 }
 0x29a   : > { %1008 = dma.done.wait (!%p796_p11), %s552_s24, 512  }
 0x29b   : > { %1010 = vsyncadd (!%p796_p11), %s552_s24, 4294966784  ;;  %p17_p13 = scmp.ge.s32.totalorder %s1085_s18, 5   ;;  %s1356_s12 = smov %s1017_s13 }
 0x29c   : > { %s1357_s13 = smov %s1021_s14  ;;  %s1358_s14 = smov %s1097_s21 }
 0x29d   : > { %s1359_s15 = smov %s1085_s18  ;;  %19 = sbr.rel (!%p17_p13) target bundleno = 6 (0x6), region = 85 }
 0x2a4   :  { %557 = vsyncpa [#allocation3], 1 }
 0x2a5   :  { %559 = vsyncpa [#allocation3 + $0x1], 1 }
 0x2a6   :  { %560 = vsyncpa [#allocation6], 1 }
 0x2a7   :  { %561 = vsyncpa [#allocation4], 1 }
 0x2a8   :  { %563 = vsyncpa [#allocation4 + $0x1], 1 }

</bundles_post_ra>
